<compile_context>
chip_gen: v6e
topology: v6e:2x2x1
jax: 0.10.0
libtpu: 0.0.40
codegen_flags: <defaults>
</compile_context>

<pallas_src>
import functools

import jax
import jax.numpy as jnp
from jax.experimental import pallas as pl
from jax.experimental.pallas import tpu as pltpu


# ---------------------------------------------------------------------------
# Kernels: one batch tile per grid step, per-tile partial sums to SMEM output.
# ---------------------------------------------------------------------------

def _ce_unweighted_kernel(logits_ref, targets_ref, out_ref, *, n_rows):
    i = pl.program_id(0)

    logits = logits_ref[...].astype(jnp.float32)            # (TN, C)
    tgt = targets_ref[...]                                   # (TN, 1) int32
    tn, c = logits.shape

    # Row-validity mask for the (possibly partial) last tile. Applied to the
    # reduced (TN,1) values BEFORE accumulation so garbage rows (which may
    # produce Inf/NaN inside max/exp/lse) contribute exactly 0.
    row_ids = i * tn + jax.lax.broadcasted_iota(jnp.int32, (tn, 1), 0)
    valid = row_ids < n_rows                                  # (TN, 1) bool

    # Numerically-stable log-sum-exp along the class (lane) axis.
    m = jnp.max(logits, axis=-1, keepdims=True)               # (TN, 1)
    shifted = logits - m                                       # (TN, C)
    lse = jnp.log(jnp.sum(jnp.exp(shifted), axis=-1, keepdims=True))  # (TN, 1)

    # Target pick via a broadcast compare against a (1, C) iota row (no
    # per-row gather, no one-hot float convert, no full-tile iota).
    cls_iota = jax.lax.broadcasted_iota(jnp.int32, (1, c), 1)  # (1, C)
    mask = cls_iota == tgt                                     # (TN, C) bool
    picked = jnp.sum(jnp.where(mask, shifted, 0.0), axis=-1, keepdims=True)

    nll = lse - picked                                         # (TN, 1) = -log p[t]
    out_ref[0, 0] = jnp.sum(jnp.where(valid, nll, 0.0))


def _ce_weighted_kernel(logits_ref, targets_ref, sample_w_ref, out_ref, *, n_rows):
    i = pl.program_id(0)

    logits = logits_ref[...].astype(jnp.float32)              # (TN, C)
    tgt = targets_ref[...]                                     # (TN, 1) int32
    sw = sample_w_ref[...]                                     # (TN, 1) f32
    tn, c = logits.shape

    row_ids = i * tn + jax.lax.broadcasted_iota(jnp.int32, (tn, 1), 0)
    valid = row_ids < n_rows                                   # (TN, 1) bool

    m = jnp.max(logits, axis=-1, keepdims=True)
    shifted = logits - m
    lse = jnp.log(jnp.sum(jnp.exp(shifted), axis=-1, keepdims=True))  # (TN, 1)

    cls_iota = jax.lax.broadcasted_iota(jnp.int32, (1, c), 1)  # (1, C)
    mask = cls_iota == tgt                                     # (TN, C) bool
    picked = jnp.sum(jnp.where(mask, shifted, 0.0), axis=-1, keepdims=True)

    nll = lse - picked                                         # (TN, 1)
    out_ref[0, 0] = jnp.sum(jnp.where(valid, sw * nll, 0.0))   # weighted numerator
    out_ref[0, 1] = jnp.sum(jnp.where(valid, sw, 0.0))         # sum of weights


# ---------------------------------------------------------------------------
# Tiling / VMEM planning.
# ---------------------------------------------------------------------------

def _vmem_plan():
    """(input-tile budget, vmem_limit_bytes), generation aware."""
    try:
        cap = pltpu.get_tpu_info().vmem_capacity_bytes
    except Exception:  # pragma: no cover - conservative fallback
        cap = 64 * 1024 * 1024
    if cap >= 96 * 1024 * 1024:                  # v5e / v6e: 128 MiB physical
        return 40 * 1024 * 1024, 80 * 1024 * 1024
    return 24 * 1024 * 1024, 48 * 1024 * 1024    # v7x: 64 MiB physical


def _choose_tile_n(n, c, logits_dtype, weighted, budget):
    """Largest batch tile whose double-buffered input blocks fit `budget`."""
    itemsize = jnp.dtype(logits_dtype).itemsize
    sublane = {4: 8, 2: 16, 1: 32}.get(itemsize, 8)

    # Per-row VMEM cost of the double-buffered input pipeline:
    #   logits:               2 * C * itemsize
    #   targets (TN,1) i32:   lane-padded to 128 -> 512 B, x2 buffers
    #   sample_w (TN,1) f32:  same padding (weighted path only)
    #   in-kernel f32 upcast of the logits tile (live temporary)
    per_row = 2 * c * itemsize + 2 * 512 + (2 * 512 if weighted else 0) + c * 4

    max_rows = max(sublane, budget // per_row)
    tile = int(max_rows)
    tile -= tile % sublane
    tile = max(tile, sublane)
    if tile >= n:
        return n          # single full-extent block (always a legal block dim)
    return tile           # sublane multiple; partial edge block handled by mask


# ---------------------------------------------------------------------------
# Wrapper.
# ---------------------------------------------------------------------------

def classification_loss(logits, targets, class_weights=None, tile_n=None):
    """Pallas implementation of ClassificationLoss.forward(logits, targets)."""
    n, c = logits.shape
    targets_i32 = targets.astype(jnp.int32)
    targets2d = targets_i32.reshape(n, 1)
    weighted = class_weights is not None

    budget, vmem_limit = _vmem_plan()
    if tile_n is None:
        tile_n = _choose_tile_n(n, c, logits.dtype, weighted, budget)
    tile_n = min(tile_n, n)
    num_tiles = pl.cdiv(n, tile_n)
    grid = (num_tiles,)

    compiler_params = pltpu.CompilerParams(
        dimension_semantics=("parallel",),   # independent per-tile partials
        vmem_limit_bytes=vmem_limit,
    )

    if not weighted:
        kernel = functools.partial(_ce_unweighted_kernel, n_rows=n)
        partials = pl.pallas_call(
            kernel,
            out_shape=jax.ShapeDtypeStruct((num_tiles, 1), jnp.float32),
            grid=grid,
            in_specs=[
                pl.BlockSpec((tile_n, c), lambda i: (i, 0)),   # logits tile
                pl.BlockSpec((tile_n, 1), lambda i: (i, 0)),   # targets tile
            ],
            out_specs=pl.BlockSpec((1, 1), lambda i: (i, 0),
                                   memory_space=pltpu.SMEM),
            compiler_params=compiler_params,
        )(logits, targets2d)
        # Tiny final reduction + mean on the host-side XLA graph.
        return jnp.sum(partials) / jnp.float32(n)

    # Weighted path: gather per-sample weights in the wrapper (O(N), vanishes
    # next to the N*C logits stream) and stream them as a (tile_n, 1) block.
    weights = jnp.asarray(class_weights, dtype=jnp.float32)
    sample_w = weights[targets_i32].reshape(n, 1)

    kernel = functools.partial(_ce_weighted_kernel, n_rows=n)
    partials = pl.pallas_call(
        kernel,
        out_shape=jax.ShapeDtypeStruct((num_tiles, 2), jnp.float32),
        grid=grid,
        in_specs=[
            pl.BlockSpec((tile_n, c), lambda i: (i, 0)),       # logits tile
            pl.BlockSpec((tile_n, 1), lambda i: (i, 0)),       # targets tile
            pl.BlockSpec((tile_n, 1), lambda i: (i, 0)),       # sample weights
        ],
        out_specs=pl.BlockSpec((1, 2), lambda i: (i, 0),
                               memory_space=pltpu.SMEM),
        compiler_params=compiler_params,
    )(logits, targets2d, sample_w)
    return jnp.sum(partials[:, 0]) / jnp.sum(partials[:, 1])


# ---------------------------------------------------------------------------
# Pure-JAX reference (matches torch.nn.CrossEntropyLoss, reduction='mean').
# ---------------------------------------------------------------------------

def _reference_ce(logits, targets, class_weights=None):
    logits = logits.astype(jnp.float32)
    lp = jax.nn.log_softmax(logits, axis=-1)
    picked = jnp.take_along_axis(lp, targets[:, None].astype(jnp.int32), axis=-1)[:, 0]
    if class_weights is None:
        w = jnp.ones((logits.shape[0],), jnp.float32)
    else:
        w = jnp.asarray(class_weights, jnp.float32)[targets]
    return jnp.sum(-picked * w) / jnp.sum(w)


if __name__ == "__main__":
    key = jax.random.PRNGKey(0)
    k1, k2, k3, k4, k5 = jax.random.split(key, 5)

    # 1) Small unweighted f32 case (matches ClassificationLoss() default ctor).
    N, C = 8, 32
    logits = jax.random.normal(k1, (N, C), dtype=jnp.float32)
    targets = jax.random.randint(k2, (N,), 0, C, dtype=jnp.int32)
    loss = jax.block_until_ready(classification_loss(logits, targets))
    ref = _reference_ce(logits, targets)
    assert jnp.allclose(loss, ref, rtol=1e-5, atol=1e-5), (loss, ref)

    # 2) Multi-tile grid with a partial edge block + class weights
    #    (tile_n override forces 4 grid steps incl. a masked edge tile).
    N2, C2 = 200, 128
    logits2 = jax.random.normal(k3, (N2, C2), dtype=jnp.float32)
    targets2 = jax.random.randint(k4, (N2,), 0, C2, dtype=jnp.int32)
    cw = jax.random.uniform(k5, (C2,), dtype=jnp.float32) + 0.5
    loss2 = jax.block_until_ready(
        classification_loss(logits2, targets2, class_weights=cw, tile_n=64))
    ref2 = _reference_ce(logits2, targets2, class_weights=cw)
    assert jnp.allclose(loss2, ref2, rtol=1e-5, atol=1e-5), (loss2, ref2)

    # 3) bf16 logits passed in native dtype (no wrapper-side upcast),
    #    auto-chosen tile (bytes-based, sublane=16 for bf16).
    logits3 = logits2.astype(jnp.bfloat16)
    loss3 = jax.block_until_ready(classification_loss(logits3, targets2))
    ref3 = _reference_ce(logits3.astype(jnp.float32), targets2)
    assert jnp.allclose(loss3, ref3, rtol=1e-4, atol=1e-4), (loss3, ref3)

    print("KERNEL_OK")
</pallas_src>

<mosaic_0001>
module attributes {stable_mosaic.version = 11 : i64} {
  func.func @_ce_unweighted_kernel(%arg0: i32, %arg1: memref<8x32xf32, #tpu.memory_space<vmem>>, %arg2: memref<8x1xi32, #tpu.memory_space<vmem>>, %arg3: memref<1x1xf32, #tpu.memory_space<smem>>) attributes {dimension_semantics = [#tpu.dimension_semantics<parallel>], iteration_bounds = array<i64: 1>, scalar_prefetch = 0 : i64, scratch_operands = 0 : i64, tpu.core_type = #tpu.core_type<tc>, window_params = [{transform_indices = @transform_0, window_bounds = array<i64: 8, 32>}, {transform_indices = @transform_1, window_bounds = array<i64: 8, 1>}, {transform_indices = @transform_2, window_bounds = array<i64: 1, 1>}]} {
    %c0 = arith.constant 0 : index
    %c0_0 = arith.constant 0 : index
    %0 = vector.load %arg1[%c0, %c0_0] : memref<8x32xf32, #tpu.memory_space<vmem>>, vector<8x32xf32>
    %c0_1 = arith.constant 0 : index
    %c0_2 = arith.constant 0 : index
    %1 = vector.load %arg2[%c0_1, %c0_2] : memref<8x1xi32, #tpu.memory_space<vmem>>, vector<8x1xi32>
    %c8_i32 = arith.constant 8 : i32
    %2 = arith.muli %arg0, %c8_i32 : i32
    %3 = tpu.iota {dimensions = array<i32: 0>} : vector<8x1xi32>
    %4 = vector.broadcast %2 : i32 to vector<8x1xi32>
    %5 = arith.addi %4, %3 : vector<8x1xi32>
    %c8_i32_3 = arith.constant 8 : i32
    %6 = vector.broadcast %c8_i32_3 : i32 to vector<8x1xi32>
    %7 = arith.cmpi slt, %5, %6 : vector<8x1xi32>
    %cst = arith.constant dense<0xFF800000> : vector<8xf32>
    %8 = vector.multi_reduction <maximumf>, %0, %cst [1] : vector<8x32xf32> to vector<8xf32>
    %9 = vector.shape_cast %8 : vector<8xf32> to vector<8x1xf32>
    %10 = vector.broadcast %9 : vector<8x1xf32> to vector<8x32xf32>
    %11 = arith.subf %0, %10 : vector<8x32xf32>
    %12 = math.exp %11 : vector<8x32xf32>
    %cst_4 = arith.constant dense<0.000000e+00> : vector<8xf32>
    %13 = vector.multi_reduction <add>, %12, %cst_4 [1] : vector<8x32xf32> to vector<8xf32>
    %14 = vector.shape_cast %13 : vector<8xf32> to vector<8x1xf32>
    %15 = math.log %14 : vector<8x1xf32>
    %16 = tpu.iota {dimensions = array<i32: 1>} : vector<1x32xi32>
    %17 = vector.broadcast %16 : vector<1x32xi32> to vector<8x32xi32>
    %18 = vector.broadcast %1 : vector<8x1xi32> to vector<8x32xi32>
    %19 = arith.cmpi eq, %17, %18 : vector<8x32xi32>
    %cst_5 = arith.constant 0.000000e+00 : f32
    %20 = vector.broadcast %cst_5 : f32 to vector<8x32xf32>
    %21 = arith.select %19, %11, %20 : vector<8x32xi1>, vector<8x32xf32>
    %cst_6 = arith.constant dense<0.000000e+00> : vector<8xf32>
    %22 = vector.multi_reduction <add>, %21, %cst_6 [1] : vector<8x32xf32> to vector<8xf32>
    %23 = vector.shape_cast %22 : vector<8xf32> to vector<8x1xf32>
    %24 = arith.subf %15, %23 : vector<8x1xf32>
    %cst_7 = arith.constant 0.000000e+00 : f32
    %25 = vector.broadcast %cst_7 : f32 to vector<8x1xf32>
    %26 = arith.select %7, %24, %25 : vector<8x1xi1>, vector<8x1xf32>
    %27 = vector.shape_cast %26 : vector<8x1xf32> to vector<1x8x1xf32>
    %cst_8 = arith.constant dense<0.000000e+00> : vector<1xf32>
    %28 = vector.multi_reduction <add>, %27, %cst_8 [1, 2] : vector<1x8x1xf32> to vector<1xf32>
    %29 = vector.shape_cast %28 : vector<1xf32> to vector<1x1x1xf32>
    %30 = vector.extract %29[0, 0, 0] : f32 from vector<1x1x1xf32>
    %c0_9 = arith.constant 0 : index
    %c0_10 = arith.constant 0 : index
    %31 = memref.load %arg3[%c0_9, %c0_10] : memref<1x1xf32, #tpu.memory_space<smem>>
    memref.store %30, %arg3[%c0_9, %c0_10] : memref<1x1xf32, #tpu.memory_space<smem>>
    return
  }
  func.func @transform_0(%arg0: i32) -> (i32, i32) {
    %c0_i32 = arith.constant 0 : i32
    %c0_i32_0 = arith.constant 0 : i32
    return %arg0, %c0_i32 : i32, i32
  }
  func.func @transform_1(%arg0: i32) -> (i32, i32) {
    %c0_i32 = arith.constant 0 : i32
    %c0_i32_0 = arith.constant 0 : i32
    return %arg0, %c0_i32 : i32, i32
  }
  func.func @transform_2(%arg0: i32) -> (i32, i32) {
    %c0_i32 = arith.constant 0 : i32
    %c0_i32_0 = arith.constant 0 : i32
    return %arg0, %c0_i32 : i32, i32
  }
}

</mosaic_0001>

<bundles_post_ra>
// kernel: tpu_custom_call.1
= control target key start
LH: loop header
LB: loop body
LE: loop exit
PB: predicated region body
PF: predicated region fallthrough
CT: control target
= control target key end

     0   :  { %vm20_vm0 = vcmask 261120   ;;  %s118_s0 = inlined_call_operand.vmem [shape: f32[8,32], index: 0, kind: input, shape index: {}]   ;;  %s119_s1 = inlined_call_operand.vmem [shape: s32[8,1], index: 1, kind: input, shape index: {}]   ;;  %s120_s2 = inlined_call_operand.hbm [shape: f32[1,1], index: 2, kind: output, shape index: {}]  }
   0x1   :  { %v12_v0 = vld [vmem:[%s118_s0] sm:$0xff] }
   0x2   :  { %7 = vsyncpa [#allocation3], 0  ;;  %v21_v1 = vsel %vm20_vm0, %v12_v0, -inf  ;;  %v89_v2 = vmov 0   ;;  %v13_v3 = vld [vmem:[%s119_s1] sm:$0xff]  ;;  %v32_v7 = vlaneseq  ;;  %vm44_vm2 = vcmask 7168  }
   0x3   :  { %74 = vset.pattern.permute.xlu0 %v89_v2  ;;  %s90_s1 = smov [#allocation2]  }
   0x4   :  { %22 = vmax.xlane.f32.xlu0 %v21_v1  ;;  %v33_v8 = vand.u32 127, %v32_v7 }
  0x1a   :  { %35 = vperm.xlu0 %74, %v13_v3  }
  0x8d   :  { %v23_v4 = vpop.xlane.xlu0 %22 }
  0x8e   :  { %v24_v5 = vsub.f32 %v12_v0, %v23_v4 }
  0x90   :  { %v25_v6 = vmul.f32 1.442695, %v24_v5 }
  0x92   :  { %75 = vpow2.f32 %v25_v6 }
  0x95   :  { %v36_v9 = vpop.permute.xlu0 %35 }
  0x96   :  { %vm37_vm1 = vcmp.eq.s32.totalorder %v33_v8, %v36_v9 }
  0x97   :  { %v38_v12 = vsel %vm37_vm1, %v24_v5, 0.0 }
  0x98   :  { %v39_v13 = vsel %vm20_vm0, %v38_v12, 0.0 }
  0x9f   :  { %v76_v10 = vpop.eup %75 }
  0xa0   :  { %v27_v11 = vsel %vm20_vm0, %v76_v10, 0.0 }
  0xa1   :  { %28 = vadd.xlane.f32.xlu1 %v27_v11 }
  0xa5   :  { %40 = vadd.xlane.f32.xlu1 %v39_v13 }
 0x12a   :  { %v29_v14 = vpop.xlane.xlu1 %28 }
 0x12b   :  { %77 = vlog2.f32 %v29_v14 }
 0x12e   :  { %v41_v17 = vpop.xlane.xlu1 %40 }
 0x138   :  { %v78_v15 = vpop.eup %77 }
 0x139   :  { %v31_v16 = vmul.f32 0.6931472, %v78_v15 }
 0x13b   :  { %v42_v18 = vsub.f32 %v31_v16, %v41_v17 }
 0x13d   :  { %v45_v19 = vsel %vm44_vm2, %v42_v18, 0.0 }
 0x13e   :  { %46 = vadd.xlane.f32.xlu1 %v45_v19 }
 0x1c7   :  { %v47_v20 = vpop.xlane.xlu1 %46 }
 0x1c8   :  { %v48_v21 = vrot.slane %v47_v20, 4 }
 0x1ca   :  { %v49_v22 = vadd.f32 %v48_v21, %v47_v20 }
 0x1cc   :  { %v50_v23 = vrot.slane %v49_v22, 2 }
 0x1ce   :  { %v51_v24 = vadd.f32 %v50_v23, %v49_v22 }
 0x1d0   :  { %v52_v25 = vrot.slane %v51_v24, 1 }
 0x1d2   :  { %v53_v26 = vadd.f32 %v52_v25, %v51_v24 }
 0x1d4   :  { %70 = vpush %v53_v26 }
 0x205   :  { %s71_s0 = spop %70 }
 0x206   :  { %56 = sst [smem:[#allocation2]] %s71_s0 }
 0x207   :  { %64 = dma.smem_to_hbm %s90_s1, 16, %s120_s2, [#allocation3]  }
 0x208   :  { %87 = dma.done.wait [#allocation3], 16  }
 0x209   :  { %88 = vsyncadd [#allocation3], 4294967280 }
 0x20a   :  { %68 = sfence }
 0x20b   :  { %69 = vsyncpa [#allocation3], 1 }

</bundles_post_ra>
